<compile_context>
chip_gen: v7x
topology: tpu7x:2x2x1
jax: 0.10.0
libtpu: 0.0.40
codegen_flags: <defaults>
</compile_context>

<pallas_src>
import numpy as np
import jax
import jax.numpy as jnp
from jax.experimental import pallas as pl
from jax.experimental.pallas import tpu as pltpu


# ---------------------------------------------------------------------------
# Repr bookkeeping (pure Python, mirrors Irrep/Repr cumdims logic)
# ---------------------------------------------------------------------------
def irrep_dim(l: int) -> int:
    return 2 * l + 1


def cumdims(lvals):
    out = [0]
    for l in lvals:
        out.append(out[-1] + irrep_dim(l))
    return out


# ---------------------------------------------------------------------------
# Pallas kernel (natural layout, MXU indicator reduction)
# ---------------------------------------------------------------------------
def _repnorm_kernel(x_ref, ind_ref, o_ref):
    # x_ref:   (RT, D)      spherical-tensor rows (natural layout)
    # ind_ref: (D, nreps)   constant 0/1 segment-indicator matrix
    # o_ref:   (RT, nreps)  per-irrep norms
    x = x_ref[...].astype(jnp.float32)          # f32 accumulation (v5e-safe)
    sq = x * x                                   # VPU
    seg = jnp.dot(sq, ind_ref[...],              # MXU: (RT,D)@(D,nreps)
                  preferred_element_type=jnp.float32)
    o_ref[...] = jnp.sqrt(seg).astype(o_ref.dtype)


def _round_up(a: int, b: int) -> int:
    return ((a + b - 1) // b) * b


def repnorm_pallas(st: jax.Array, lvals, *, row_tile: int = 8192) -> jax.Array:
    """Pallas implementation of RepNorm.forward."""
    cds = cumdims(lvals)
    nreps = len(lvals)
    D = st.shape[-1]
    assert D == cds[-1], f"last dim {D} must equal repr dim {cds[-1]}"

    lead = st.shape[:-1]
    R = 1
    for s in lead:
        R *= int(s)

    # Free, contiguous reshape (no transpose / no extra HBM pass).
    x = st.reshape(R, D)

    # Constant segment-indicator matrix (D, nreps): ind[d, i] = 1 iff
    # cds[i] <= d < cds[i+1].  Loaded into VMEM once (invariant block index).
    ind_np = np.zeros((D, nreps), dtype=np.float32)
    for i in range(nreps):
        ind_np[cds[i]:cds[i + 1], i] = 1.0
    ind = jnp.asarray(ind_np)

    SMALL = 1024
    if R <= SMALL:
        # Tiny problem: one block covering the whole array (full-dim exception
        # on both axes); no padding, no masking.
        rt = R
    elif R <= row_tile:
        # Mid-size: force >=2 grid steps so megacore 'parallel' keeps both
        # v7x TensorCores busy (no-op on v5e/v6e).
        rt = _round_up(pl.cdiv(R, 2), 16)
    else:
        rt = _round_up(row_tile, 16)
    grid = (pl.cdiv(R, rt),)

    out = pl.pallas_call(
        _repnorm_kernel,
        out_shape=jax.ShapeDtypeStruct((R, nreps), st.dtype),
        grid_spec=pltpu.PrefetchScalarGridSpec(
            num_scalar_prefetch=0,
            grid=grid,
            in_specs=[
                pl.BlockSpec((rt, D), lambda i: (i, 0)),
                pl.BlockSpec((D, nreps), lambda i: (0, 0)),  # invariant block
            ],
            out_specs=pl.BlockSpec((rt, nreps), lambda i: (i, 0)),
        ),
        compiler_params=pltpu.CompilerParams(
            # Row axis is fully independent -> megacore shards it across both
            # TensorCores on v7x; harmless on v5e/v6e.
            dimension_semantics=("parallel",),
            # Explicit budget: ~16 MiB of double-buffered blocks at rt=8192
            # (narrow last dims are lane-padded to 128 in VMEM), safe on
            # v5e (16 MiB default scoped), v6e and v7x (64 MiB physical).
            vmem_limit_bytes=32 * 1024 * 1024,
        ),
    )(x, ind)

    return out.reshape(*lead, nreps)


# ---------------------------------------------------------------------------
# Pure-JAX reference (mirrors the PyTorch forward loop)
# ---------------------------------------------------------------------------
def repnorm_ref(st: jax.Array, lvals) -> jax.Array:
    cds = cumdims(lvals)
    nreps = len(lvals)
    cols = []
    for i in range(nreps):
        seg = st[..., cds[i]:cds[i + 1]].astype(jnp.float32)
        cols.append(jnp.sqrt(jnp.sum(seg * seg, axis=-1)))
    return jnp.stack(cols, axis=-1).astype(st.dtype)


# ---------------------------------------------------------------------------
# Main
# ---------------------------------------------------------------------------
if __name__ == "__main__":
    # Repr with degrees l = [0, 1, 2]  ->  D = 1 + 3 + 5 = 9
    lvals = [0, 1, 2]
    D = cumdims(lvals)[-1]          # 9
    mult = 4
    batch, seq = 2, 8

    key = jax.random.PRNGKey(0)
    # Spherical tensor: (batch, seq, mult, D) — RepNorm reduces over last axis.
    st = jax.random.normal(key, (batch, seq, mult, D), dtype=jnp.float32)

    # 1) Small problem: single-block path (R = 64).
    out = jax.block_until_ready(repnorm_pallas(st, lvals))
    ref = repnorm_ref(st, lvals)
    assert out.shape == st.shape[:-1] + (len(lvals),), out.shape
    assert out.dtype == st.dtype
    assert jnp.allclose(out, ref, atol=1e-5, rtol=1e-5), (
        float(jnp.max(jnp.abs(out - ref)))
    )

    # 2) Mid-size problem (R = 1050): default row_tile -> 2-step grid
    #    (megacore split), ragged last block exercises masked writeback.
    st2 = jax.random.normal(jax.random.PRNGKey(0), (3, 50, 7, D),
                            dtype=jnp.float32)
    out2 = jax.block_until_ready(repnorm_pallas(st2, lvals))
    ref2 = repnorm_ref(st2, lvals)
    assert out2.shape == st2.shape[:-1] + (len(lvals),), out2.shape
    assert jnp.allclose(out2, ref2, atol=1e-5, rtol=1e-5), (
        float(jnp.max(jnp.abs(out2 - ref2)))
    )

    # 3) Same input with a small explicit row_tile: multi-block grid (5 steps)
    #    with a ragged last tile.
    out3 = jax.block_until_ready(repnorm_pallas(st2, lvals, row_tile=256))
    assert jnp.allclose(out3, ref2, atol=1e-5, rtol=1e-5), (
        float(jnp.max(jnp.abs(out3 - ref2)))
    )

    print("KERNEL_OK")
</pallas_src>

<mosaic_0001>
module attributes {stable_mosaic.version = 11 : i64} {
  func.func @_repnorm_kernel(%arg0: i32, %arg1: memref<64x9xf32, #tpu.memory_space<vmem>>, %arg2: memref<9x3xf32, #tpu.memory_space<vmem>>, %arg3: memref<64x3xf32, #tpu.memory_space<vmem>>) attributes {dimension_semantics = [#tpu.dimension_semantics<parallel>], iteration_bounds = array<i64: 1>, scalar_prefetch = 0 : i64, scratch_operands = 0 : i64, tpu.core_type = #tpu.core_type<tc>, window_params = [{transform_indices = @transform_0, window_bounds = array<i64: 64, 9>}, {pipeline_mode = #tpu.pipeline_mode<synchronous>, transform_indices = @transform_1, window_bounds = array<i64: 9, 3>}, {transform_indices = @transform_2, window_bounds = array<i64: 64, 3>}]} {
    %c0 = arith.constant 0 : index
    %c0_0 = arith.constant 0 : index
    %0 = vector.load %arg1[%c0, %c0_0] : memref<64x9xf32, #tpu.memory_space<vmem>>, vector<64x9xf32>
    %1 = arith.mulf %0, %0 : vector<64x9xf32>
    %c0_1 = arith.constant 0 : index
    %c0_2 = arith.constant 0 : index
    %2 = vector.load %arg2[%c0_1, %c0_2] : memref<9x3xf32, #tpu.memory_space<vmem>>, vector<9x3xf32>
    %cst = arith.constant dense<0.000000e+00> : vector<64x3xf32>
    %3 = tpu.matmul %1, %2, %cst {dimension_numbers = #tpu.dot_dimension_numbers<[1], [0], [0], [1], [0, 0, 1, 1], [], []>} : vector<64x9xf32>, vector<9x3xf32>, vector<64x3xf32> -> vector<64x3xf32>
    %4 = math.sqrt %3 : vector<64x3xf32>
    %c0_3 = arith.constant 0 : index
    %c0_4 = arith.constant 0 : index
    %5 = vector.load %arg3[%c0_3, %c0_4] : memref<64x3xf32, #tpu.memory_space<vmem>>, vector<64x3xf32>
    tpu.vector_store %arg3[%c0_3, %c0_4], %4 {strides = array<i32>} : memref<64x3xf32, #tpu.memory_space<vmem>>, vector<64x3xf32>,
    return
  }
  func.func @transform_0(%arg0: i32) -> (i32, i32) {
    %c0_i32 = arith.constant 0 : i32
    %c0_i32_0 = arith.constant 0 : i32
    return %arg0, %c0_i32 : i32, i32
  }
  func.func @transform_1(%arg0: i32) -> (i32, i32) {
    %c0_i32 = arith.constant 0 : i32
    %c0_i32_0 = arith.constant 0 : i32
    %c0_i32_1 = arith.constant 0 : i32
    return %c0_i32, %c0_i32_0 : i32, i32
  }
  func.func @transform_2(%arg0: i32) -> (i32, i32) {
    %c0_i32 = arith.constant 0 : i32
    %c0_i32_0 = arith.constant 0 : i32
    return %arg0, %c0_i32 : i32, i32
  }
}

</mosaic_0001>

<bundles_post_ra>
// kernel: tpu_custom_call.1
= control target key start
LH: loop header
LB: loop body
LE: loop exit
PB: predicated region body
PF: predicated region fallthrough
CT: control target
= control target key end

     0   :  { %vm54_vm0 = vcmask 1040384   ;;  %vm292_vm1 = vmmov 1   ;;  %vm29_vm3 = vcmask 72704   ;;  %vm219_vm4 = vcmask 23552   ;;  %s428_s1 = inlined_call_operand.vmem [shape: f32[9,3], index: 1, kind: input, shape index: {}]   ;;  %s429_s0 = inlined_call_operand.vmem [shape: f32[64,9], index: 0, kind: input, shape index: {}]   ;;  %s430_s2 = inlined_call_operand.vmem [shape: f32[64,3], index: 2, kind: output, shape index: {}]  }
   0x1   :  { %v27_v0 = vld [vmem:[%s428_s1] sm:$0xff]  ;;  %v28_v1 = vld [vmem:[%s428_s1 + $0x8] sm:$0x1]  ;;  %vm314_vm2 = vmpackc.low %vm54_vm0, %vm292_vm1 }
   0x2   :  { %v267_v3 = vpack.c.bf16 %v28_v1, %v27_v0  ;;  %v11_v4 = vld [vmem:[%s429_s0] sm:$0xff]  ;;  %v12_v6 = vld [vmem:[%s429_s0 + $0x8] sm:$0xff]  ;;  %v13_v10 = vld [vmem:[%s429_s0 + $0x10] sm:$0xff] }
   0x3   :  { %v15_v5 = vld [vmem:[%s429_s0 + $0x20] sm:$0xff]  ;;  %v19_v7 = vmul.f32 %v11_v4, %v11_v4  ;;  %v16_v9 = vld [vmem:[%s429_s0 + $0x28] sm:$0xff]  ;;  %v17_v11 = vld [vmem:[%s429_s0 + $0x30] sm:$0xff]  ;;  %v20_v12 = vmul.f32 %v12_v6, %v12_v6  ;;  %v21_v14 = vmul.f32 %v13_v10, %v13_v10 }
   0x4   :  { %v23_v8 = vmul.f32 %v15_v5, %v15_v5  ;;  %269 = vmatprep.subr.msk.bf16.mxu0 %vm314_vm2, %v267_v3  ;;  %273 = vmatprep.subr.msk.bf16.mxu1 %vm314_vm2, %v267_v3  ;;  %v24_v13 = vmul.f32 %v16_v9, %v16_v9  ;;  %v25_v15 = vmul.f32 %v17_v11, %v17_v11  ;;  %v14_v16 = vld [vmem:[%s429_s0 + $0x18] sm:$0xff] }
   0x5   :  { %272 = vmatpush3.bf16.msk.msra.mxu0 %vm314_vm2, %v267_v3  ;;  %274 = vmatpush3.bf16.msk.msra.mxu1 %vm314_vm2, %v267_v3  ;;  %v18_v17 = vld [vmem:[%s429_s0 + $0x38] sm:$0xff]  ;;  %v22_v18 = vmul.f32 %v14_v16, %v14_v16 }
   0x6   :  { %255 = vmatprep.mubr.msk.f32.mxu0 %vm29_vm3, %v19_v7  ;;  %261 = vmatprep.mubr.msk.f32.mxu1 %vm29_vm3, %v23_v8  ;;  %v26_v19 = vmul.f32 %v18_v17, %v18_v17 }
   0x8   :  { %256 = vmatmul.mubr.msk.f32.vlgmr.msra.gmra.mrb[0].mxu0 %vm29_vm3, %v20_v12  ;;  %262 = vmatmul.mubr.msk.f32.vlgmr.msra.gmra.mrb[0].mxu1 %vm29_vm3, %v24_v13 }
   0x9   :  { %258 = vmatprep.mubr.msk.f32.mxu0 %vm29_vm3, %v21_v14  ;;  %264 = vmatprep.mubr.msk.f32.mxu1 %vm29_vm3, %v25_v15 }
   0xc   :  { %259 = vmatmul.mubr.msk.f32.gmra.mrb[2].mxu0 %vm29_vm3, %v22_v18  ;;  %265 = vmatmul.mubr.msk.f32.gmra.mrb[2].mxu1 %vm29_vm3, %v26_v19 }
  0xdb   :  { %v257_v20 = vpop.f32.mrb[0].mxu0  ;;  %v263_v21 = vpop.f32.mrb[0].mxu1 }
  0xdc   :  { %276 = vrsqrt.f32 %v257_v20  ;;  %v124_v22 = vpop.f32.mrb[1].mxu0  ;;  %v144_v23 = vpop.f32.mrb[1].mxu1  ;;  %vm172_vm5 = vcmp.eq.f32.partialorder %v257_v20, inf  ;;  %vm174_vm6 = vcmp.eq.f32.partialorder %v257_v20, 0.0  ;;  %v175_v28 = vand.u32 2147483648, %v257_v20 }
  0xdd   :  { %278 = vrsqrt.f32 %v263_v21  ;;  %vm200_vm7 = vcmp.eq.f32.partialorder %v263_v21, inf  ;;  %vm202_vm8 = vcmp.eq.f32.partialorder %v263_v21, 0.0  ;;  %v203_v30 = vand.u32 2147483648, %v263_v21 }
  0xde   :  { %280 = vrsqrt.f32 %v124_v22  ;;  %vm165_vm9 = vcmp.eq.f32.partialorder %v124_v22, inf  ;;  %vm167_vm10 = vcmp.eq.f32.partialorder %v124_v22, 0.0  ;;  %v168_v33 = vand.u32 2147483648, %v124_v22 }
  0xdf   :  { %282 = vrsqrt.f32 %v144_v23  ;;  %v260_v24 = vpop.f32.mrb[2].mxu0  ;;  %v358_v25 = vpop.f32.mrb[2].mxu1  ;;  %vm193_vm11 = vcmp.eq.f32.partialorder %v144_v23, inf  ;;  %vm195_vm12 = vcmp.eq.f32.partialorder %v144_v23, 0.0  ;;  %v196_v36 = vand.u32 2147483648, %v144_v23 }
  0xe0   :  { %284 = vrsqrt.f32 %v260_v24  ;;  %v360_v26 = vpop.f32.mrb[3].mxu0  ;;  %v362_v27 = vpop.f32.mrb[3].mxu1  ;;  %vm186_vm13 = vcmp.eq.f32.partialorder %v260_v24, inf  ;;  %vm188_vm14 = vcmp.eq.f32.partialorder %v260_v24, 0.0  ;;  %v189_v40 = vand.u32 2147483648, %v260_v24 }
  0xe1   :  { %286 = vrsqrt.f32 %v358_v25  ;;  %vm214_vm15 = vcmp.eq.f32.partialorder %v358_v25, inf  ;;  %vm216_vm0 = vcmp.eq.f32.partialorder %v358_v25, 0.0  ;;  %v217_v49 = vand.u32 2147483648, %v358_v25 }
  0xe2   :  { %288 = vrsqrt.f32 %v360_v26  ;;  %vm179_vm1 = vcmp.eq.f32.partialorder %v360_v26, inf  ;;  %vm181_vm2 = vcmp.eq.f32.partialorder %v360_v26, 0.0  ;;  %v182_v60 = vand.u32 2147483648, %v360_v26 }
  0xe3   :  { %290 = vrsqrt.f32 %v362_v27  ;;  %vm207_vm3 = vcmp.eq.f32.partialorder %v362_v27, inf  ;;  %v210_v0 = vand.u32 2147483648, %v362_v27 }
  0xe6   :  { %v277_v29 = vpop.eup %276 }
  0xe7   :  { %v279_v31 = vpop.eup %278  ;;  %v171_v32 = vmul.f32 %v277_v29, %v257_v20 }
  0xe8   :  { %v281_v34 = vpop.eup %280  ;;  %v199_v35 = vmul.f32 %v279_v31, %v263_v21 }
  0xe9   :  { %v283_v37 = vpop.eup %282  ;;  %v173_v38 = vsel %vm172_vm5, %v257_v20, %v171_v32  ;;  %v164_v39 = vmul.f32 %v281_v34, %v124_v22  ;;  %vm209_vm5 = vcmp.eq.f32.partialorder %v362_v27, 0.0 }
  0xea   :  { %v285_v41 = vpop.eup %284  ;;  %v176_v42 = vsel %vm174_vm6, %v175_v28, %v173_v38  ;;  %v201_v43 = vsel %vm200_vm7, %v263_v21, %v199_v35  ;;  %v192_v44 = vmul.f32 %v283_v37, %v144_v23 }
  0xeb   :  { %v287_v45 = vpop.eup %286  ;;  %221 = vst.msk [vmem:[%s430_s2 + $0x8] sm:$0xff] %vm219_vm4, %v176_v42  ;;  %v204_v46 = vsel %vm202_vm8, %v203_v30, %v201_v43  ;;  %v166_v47 = vsel %vm165_vm9, %v124_v22, %v164_v39  ;;  %v185_v48 = vmul.f32 %v285_v41, %v260_v24 }
  0xec   :  { %v289_v50 = vpop.eup %288  ;;  %225 = vst.msk [vmem:[%s430_s2 + $0x28] sm:$0xff] %vm219_vm4, %v204_v46  ;;  %v169_v51 = vsel %vm167_vm10, %v168_v33, %v166_v47  ;;  %v194_v52 = vsel %vm193_vm11, %v144_v23, %v192_v44  ;;  %v213_v53 = vmul.f32 %v287_v45, %v358_v25 }
  0xed   :  { %v291_v54 = vpop.eup %290  ;;  %220 = vst.msk [vmem:[%s430_s2] sm:$0xff] %vm219_vm4, %v169_v51  ;;  %v197_v55 = vsel %vm195_vm12, %v196_v36, %v194_v52  ;;  %v187_v56 = vsel %vm186_vm13, %v260_v24, %v185_v48  ;;  %v178_v57 = vmul.f32 %v289_v50, %v360_v26 }
  0xee   :  { %224 = vst.msk [vmem:[%s430_s2 + $0x20] sm:$0xff] %vm219_vm4, %v197_v55  ;;  %v190_v58 = vsel %vm188_vm14, %v189_v40, %v187_v56  ;;  %v215_v59 = vsel %vm214_vm15, %v358_v25, %v213_v53  ;;  %v206_v61 = vmul.f32 %v291_v54, %v362_v27 }
  0xef   :  { %223 = vst.msk [vmem:[%s430_s2 + $0x18] sm:$0xff] %vm219_vm4, %v190_v58  ;;  %v218_v62 = vsel %vm216_vm0, %v217_v49, %v215_v59  ;;  %v180_v63 = vsel %vm179_vm1, %v360_v26, %v178_v57 }
  0xf0   :  { %227 = vst.msk [vmem:[%s430_s2 + $0x38] sm:$0xff] %vm219_vm4, %v218_v62  ;;  %v183_v1 = vsel %vm181_vm2, %v182_v60, %v180_v63  ;;  %v208_v2 = vsel %vm207_vm3, %v362_v27, %v206_v61 }
  0xf1   :  { %222 = vst.msk [vmem:[%s430_s2 + $0x10] sm:$0xff] %vm219_vm4, %v183_v1  ;;  %v211_v3 = vsel %vm209_vm5, %v210_v0, %v208_v2 }
  0xf2   :  { %226 = vst.msk [vmem:[%s430_s2 + $0x30] sm:$0xff] %vm219_vm4, %v211_v3 }

</bundles_post_ra>
